<compile_context>
chip_gen: v5e
topology: v5e:2x2
jax: 0.10.0
libtpu: 0.0.40
codegen_flags: <defaults>
</compile_context>

<pallas_src>
import functools

import numpy as np
import jax
import jax.numpy as jnp
from jax import lax
from jax.experimental import pallas as pl
from jax.experimental.pallas import tpu as pltpu


def _round_up(x, m):
    return (x + m - 1) // m * m


def _intensity_ode_kernel(t_ref, state_ref, w1_ref, wt1_ref, b1_ref,
                          w2_ref, b2_ref, out_ref, *, s_dim):
    t = t_ref[0, 0]                                   # solver time (SMEM scalar)
    state = state_ref[...]                            # (TB, S)

    # Fused first layer: lanes 0:Hd -> dstate hidden, lanes Hd:Hd+Hi -> intensity hidden,
    # remaining lanes are zero padding (tanh(0)=0; second-layer rows there are zero).
    h = jnp.tanh(
        jnp.dot(state, w1_ref[...], preferred_element_type=jnp.float32)
        + t * wt1_ref[...]                            # VPU scalar*row broadcast (time term)
        + b1_ref[...]
    )                                                 # (TB, Hc), lane-dense

    # Fused second layer: lanes 0:S -> dstate, lane S -> intensity logit (the "-2.0"
    # is already folded into the packed bias), remaining lanes are zero padding.
    lin = (jnp.dot(h, w2_ref[...], preferred_element_type=jnp.float32)
           + b2_ref[...])                             # (TB, S_out), lane-dense

    inten = jax.nn.sigmoid(lin) * 50.0                # EUP pass over whole slab (free slot)
    lane = lax.broadcasted_iota(jnp.int32, lin.shape, 1)
    out_ref[...] = jnp.where(lane == s_dim, inten, lin).astype(out_ref.dtype)


def pack_intensity_ode_params(params, *, hdim, state_dim):
    """Pack the two MLPs into fused, lane-padded weights. Call ONCE; reuse across RK stages."""
    f32 = jnp.float32
    wi1 = params["wi1"].astype(f32)   # (hdim, Hi)
    bi1 = params["bi1"].astype(f32)   # (1, Hi)
    wi2 = params["wi2"].astype(f32)   # (1, Hi)
    bi2 = params["bi2"].astype(f32)   # (1, 1)
    wd1 = params["wd1"].astype(f32)   # (S, Hd)
    wt = params["wt"].astype(f32)     # (1, Hd)
    bd1 = params["bd1"].astype(f32)   # (1, Hd)
    wd2 = params["wd2"].astype(f32)   # (Hd, S)
    bd2 = params["bd2"].astype(f32)   # (1, S)

    S = state_dim
    Hi = wi1.shape[1]
    Hd = wd1.shape[1]
    Hc = _round_up(Hd + Hi, 128)      # fused hidden width, lane/MXU friendly
    So = _round_up(S + 1, 128)        # fused output: dstate lanes 0:S, intensity lane S

    w1 = jnp.zeros((S, Hc), f32)
    w1 = w1.at[:, :Hd].set(wd1)
    w1 = w1.at[:hdim, Hd:Hd + Hi].set(wi1)            # zero rows past hdim == the [:, :hdim] slice

    wt1 = jnp.zeros((1, Hc), f32).at[:, :Hd].set(wt)  # time term only feeds the dstate hidden
    b1 = jnp.zeros((1, Hc), f32)
    b1 = b1.at[:, :Hd].set(bd1).at[:, Hd:Hd + Hi].set(bi1)

    w2 = jnp.zeros((Hc, So), f32)
    w2 = w2.at[:Hd, :S].set(wd2)
    w2 = w2.at[Hd:Hd + Hi, S].set(wi2.reshape(-1))    # intensity head as one extra column

    b2 = jnp.zeros((1, So), f32)
    b2 = b2.at[:, :S].set(bd2)
    b2 = b2.at[0, S].set(bi2[0, 0] - 2.0)             # constant-fold the "-2.0"

    return {"w1": w1, "wt1": wt1, "b1": b1, "w2": w2, "b2": b2,
            "S": S, "S_out": So, "Hc": Hc}


def intensity_ode_forward(t, state, packed, *, tb=None):
    """Pallas version of IntensityODEFunc.forward(t, (Lambda, tpp_state))."""
    Lambda, tpp_state = state                          # Lambda is not read in forward
    B, S = tpp_state.shape
    assert S == packed["S"]
    if tb is None:
        tb = B if B <= 256 else 256                    # collapse grid for small B; 256-row tiles at scale
    assert B % tb == 0, "batch must be a multiple of the batch tile"
    grid = (B // tb,)
    Hc, So = packed["Hc"], packed["S_out"]

    t_arr = jnp.full((1, 1), t, dtype=jnp.float32)
    smem = pl.BlockSpec(memory_space=pltpu.MemorySpace.SMEM)

    def resident(arr):
        # Same block every grid step -> stays VMEM-resident, no per-step DMA.
        return pl.BlockSpec(arr.shape, lambda i: (0, 0))

    # Only shard across cores when each per-core tile actually fills the MXU rows.
    sem = ("parallel",) if (grid[0] > 1 and tb >= 128) else ("arbitrary",)

    flops = 2 * B * S * Hc + 2 * B * Hc * So + 3 * B * Hc + 2 * B * So
    transcendentals = B * (Hc + So)
    bytes_accessed = 4 * (B * S + B * So + 1
                          + S * Hc + 2 * Hc + Hc * So + So)

    out = pl.pallas_call(
        functools.partial(_intensity_ode_kernel, s_dim=S),
        out_shape=jax.ShapeDtypeStruct((B, So), jnp.float32),
        grid=grid,
        in_specs=[
            smem,                                       # t scalar in SMEM
            pl.BlockSpec((tb, S), lambda i: (i, 0)),    # tpp_state tile
            resident(packed["w1"]), resident(packed["wt1"]), resident(packed["b1"]),
            resident(packed["w2"]), resident(packed["b2"]),
        ],
        out_specs=pl.BlockSpec((tb, So), lambda i: (i, 0)),
        compiler_params=pltpu.CompilerParams(dimension_semantics=sem),
        cost_estimate=pl.CostEstimate(flops=flops,
                                      transcendentals=transcendentals,
                                      bytes_accessed=bytes_accessed),
    )(t_arr, tpp_state,
      packed["w1"], packed["wt1"], packed["b1"], packed["w2"], packed["b2"])

    intensity = out[:, S]                               # (B,)  == .reshape(-1)
    dstate = out[:, :S].astype(tpp_state.dtype)         # (B, S)
    return intensity, dstate


def _reference_forward(t, Lambda, tpp_state, p, hdim):
    """Plain-JAX reference mirroring the PyTorch forward semantics."""
    x = tpp_state[..., :hdim].astype(p["wi1"].dtype)
    h_i = jnp.tanh(x @ p["wi1"] + p["bi1"])
    logit = jnp.sum(h_i * p["wi2"], axis=-1, keepdims=True) + p["bi2"]
    intensity = (jax.nn.sigmoid(logit - 2.0) * 50.0).reshape(-1)
    h_d = jnp.tanh(tpp_state @ p["wd1"] + t * p["wt"] + p["bd1"])
    dstate = h_d @ p["wd2"] + p["bd2"]
    return intensity, dstate


if __name__ == "__main__":
    key = jax.random.PRNGKey(0)
    keys = jax.random.split(key, 11)

    B, S, HDIM, HI, HD = 16, 48, 32, 32, 64   # batch, state dim, hdim, intensity/dstate hidden
    dtype = jnp.float32

    tpp_state = jax.random.normal(keys[0], (B, S), dtype=dtype)
    Lambda = jax.random.uniform(keys[1], (B,), dtype=dtype)
    t = 0.3

    params = {
        "wi1": jax.random.normal(keys[2], (HDIM, HI), dtype) / np.sqrt(HDIM),
        "bi1": jax.random.normal(keys[3], (1, HI), dtype) * 0.1,
        "wi2": jax.random.normal(keys[4], (1, HI), dtype) / np.sqrt(HI),
        "bi2": jax.random.normal(keys[5], (1, 1), dtype) * 0.1,
        "wd1": jax.random.normal(keys[6], (S, HD), dtype) / np.sqrt(S),
        "wt":  jax.random.normal(keys[7], (1, HD), dtype),
        "bd1": jax.random.normal(keys[8], (1, HD), dtype) * 0.1,
        "wd2": jax.random.normal(keys[9], (HD, S), dtype) / np.sqrt(HD),
        "bd2": jax.random.normal(keys[10], (1, S), dtype) * 0.1,
    }

    # Pack once (would be reused across every RK-stage call in the odeint loop).
    packed = pack_intensity_ode_params(params, hdim=HDIM, state_dim=S)

    intensity, dstate = intensity_ode_forward(t, (Lambda, tpp_state), packed)
    jax.block_until_ready((intensity, dstate))

    r_int, r_dstate = _reference_forward(t, Lambda, tpp_state, params, HDIM)
    np.testing.assert_allclose(np.asarray(intensity), np.asarray(r_int),
                               rtol=1e-4, atol=1e-4)
    np.testing.assert_allclose(np.asarray(dstate), np.asarray(r_dstate),
                               rtol=1e-4, atol=1e-4)

    print("KERNEL_OK")
</pallas_src>

<mosaic_0001>
module attributes {stable_mosaic.version = 11 : i64} {
  func.func @_intensity_ode_kernel(%arg0: i32, %arg1: memref<1x1xf32, #tpu.memory_space<smem>>, %arg2: memref<16x48xf32, #tpu.memory_space<vmem>>, %arg3: memref<48x128xf32, #tpu.memory_space<vmem>>, %arg4: memref<1x128xf32, #tpu.memory_space<vmem>>, %arg5: memref<1x128xf32, #tpu.memory_space<vmem>>, %arg6: memref<128x128xf32, #tpu.memory_space<vmem>>, %arg7: memref<1x128xf32, #tpu.memory_space<vmem>>, %arg8: memref<16x128xf32, #tpu.memory_space<vmem>>) attributes {dimension_semantics = [#tpu.dimension_semantics<arbitrary>], iteration_bounds = array<i64: 1>, scalar_prefetch = 0 : i64, scratch_operands = 0 : i64, tpu.core_type = #tpu.core_type<tc>, window_params = [{transform_indices = @transform_0, window_bounds = array<i64: 1, 1>}, {transform_indices = @transform_1, window_bounds = array<i64: 16, 48>}, {pipeline_mode = #tpu.pipeline_mode<synchronous>, transform_indices = @transform_2, window_bounds = array<i64: 48, 128>}, {pipeline_mode = #tpu.pipeline_mode<synchronous>, transform_indices = @transform_3, window_bounds = array<i64: 1, 128>}, {pipeline_mode = #tpu.pipeline_mode<synchronous>, transform_indices = @transform_4, window_bounds = array<i64: 1, 128>}, {pipeline_mode = #tpu.pipeline_mode<synchronous>, transform_indices = @transform_5, window_bounds = array<i64: 128, 128>}, {pipeline_mode = #tpu.pipeline_mode<synchronous>, transform_indices = @transform_6, window_bounds = array<i64: 1, 128>}, {transform_indices = @transform_7, window_bounds = array<i64: 16, 128>}]} {
    %c0 = arith.constant 0 : index
    %c0_0 = arith.constant 0 : index
    %0 = memref.load %arg1[%c0, %c0_0] : memref<1x1xf32, #tpu.memory_space<smem>>
    %c0_1 = arith.constant 0 : index
    %c0_2 = arith.constant 0 : index
    %1 = vector.load %arg2[%c0_1, %c0_2] : memref<16x48xf32, #tpu.memory_space<vmem>>, vector<16x48xf32>
    %c0_3 = arith.constant 0 : index
    %c0_4 = arith.constant 0 : index
    %2 = vector.load %arg3[%c0_3, %c0_4] : memref<48x128xf32, #tpu.memory_space<vmem>>, vector<48x128xf32>
    %cst = arith.constant dense<0.000000e+00> : vector<16x128xf32>
    %3 = tpu.matmul %1, %2, %cst {dimension_numbers = #tpu.dot_dimension_numbers<[1], [0], [0], [1], [0, 0, 1, 1], [], []>} : vector<16x48xf32>, vector<48x128xf32>, vector<16x128xf32> -> vector<16x128xf32>
    %c0_5 = arith.constant 0 : index
    %c0_6 = arith.constant 0 : index
    %4 = vector.load %arg4[%c0_5, %c0_6] : memref<1x128xf32, #tpu.memory_space<vmem>>, vector<1x128xf32>
    %5 = vector.broadcast %0 : f32 to vector<1x128xf32>
    %6 = arith.mulf %5, %4 : vector<1x128xf32>
    %7 = vector.broadcast %6 : vector<1x128xf32> to vector<16x128xf32>
    %8 = arith.addf %3, %7 : vector<16x128xf32>
    %c0_7 = arith.constant 0 : index
    %c0_8 = arith.constant 0 : index
    %9 = vector.load %arg5[%c0_7, %c0_8] : memref<1x128xf32, #tpu.memory_space<vmem>>, vector<1x128xf32>
    %10 = vector.broadcast %9 : vector<1x128xf32> to vector<16x128xf32>
    %11 = arith.addf %8, %10 : vector<16x128xf32>
    %12 = math.tanh %11 : vector<16x128xf32>
    %c0_9 = arith.constant 0 : index
    %c0_10 = arith.constant 0 : index
    %13 = vector.load %arg6[%c0_9, %c0_10] : memref<128x128xf32, #tpu.memory_space<vmem>>, vector<128x128xf32>
    %cst_11 = arith.constant dense<0.000000e+00> : vector<16x128xf32>
    %14 = tpu.matmul %12, %13, %cst_11 {dimension_numbers = #tpu.dot_dimension_numbers<[1], [0], [0], [1], [0, 0, 1, 1], [], []>} : vector<16x128xf32>, vector<128x128xf32>, vector<16x128xf32> -> vector<16x128xf32>
    %c0_12 = arith.constant 0 : index
    %c0_13 = arith.constant 0 : index
    %15 = vector.load %arg7[%c0_12, %c0_13] : memref<1x128xf32, #tpu.memory_space<vmem>>, vector<1x128xf32>
    %16 = vector.broadcast %15 : vector<1x128xf32> to vector<16x128xf32>
    %17 = arith.addf %14, %16 : vector<16x128xf32>
    %18 = arith.negf %17 : vector<16x128xf32>
    %19 = math.exp %18 : vector<16x128xf32>
    %cst_14 = arith.constant 1.000000e+00 : f32
    %20 = vector.broadcast %cst_14 : f32 to vector<16x128xf32>
    %21 = arith.addf %20, %19 : vector<16x128xf32>
    %22 = arith.divf %20, %21 : vector<16x128xf32>
    %cst_15 = arith.constant 5.000000e+01 : f32
    %23 = vector.broadcast %cst_15 : f32 to vector<16x128xf32>
    %24 = arith.mulf %22, %23 : vector<16x128xf32>
    %25 = tpu.iota {dimensions = array<i32: 1>} : vector<16x128xi32>
    %c48_i32 = arith.constant 48 : i32
    %26 = vector.broadcast %c48_i32 : i32 to vector<16x128xi32>
    %27 = arith.cmpi eq, %25, %26 : vector<16x128xi32>
    %28 = arith.select %27, %24, %17 : vector<16x128xi1>, vector<16x128xf32>
    %c0_16 = arith.constant 0 : index
    %c0_17 = arith.constant 0 : index
    %29 = vector.load %arg8[%c0_16, %c0_17] : memref<16x128xf32, #tpu.memory_space<vmem>>, vector<16x128xf32>
    tpu.vector_store %arg8[%c0_16, %c0_17], %28 {strides = array<i32>} : memref<16x128xf32, #tpu.memory_space<vmem>>, vector<16x128xf32>,
    return
  }
  func.func @transform_0(%arg0: i32) -> (i32, i32) {
    %c0_i32 = arith.constant 0 : i32
    %c0_i32_0 = arith.constant 0 : i32
    %c0_i32_1 = arith.constant 0 : i32
    return %c0_i32, %c0_i32_0 : i32, i32
  }
  func.func @transform_1(%arg0: i32) -> (i32, i32) {
    %c0_i32 = arith.constant 0 : i32
    %c0_i32_0 = arith.constant 0 : i32
    return %arg0, %c0_i32 : i32, i32
  }
  func.func @transform_2(%arg0: i32) -> (i32, i32) {
    %c0_i32 = arith.constant 0 : i32
    %c0_i32_0 = arith.constant 0 : i32
    %c0_i32_1 = arith.constant 0 : i32
    return %c0_i32, %c0_i32_0 : i32, i32
  }
  func.func @transform_3(%arg0: i32) -> (i32, i32) {
    %c0_i32 = arith.constant 0 : i32
    %c0_i32_0 = arith.constant 0 : i32
    %c0_i32_1 = arith.constant 0 : i32
    return %c0_i32, %c0_i32_0 : i32, i32
  }
  func.func @transform_4(%arg0: i32) -> (i32, i32) {
    %c0_i32 = arith.constant 0 : i32
    %c0_i32_0 = arith.constant 0 : i32
    %c0_i32_1 = arith.constant 0 : i32
    return %c0_i32, %c0_i32_0 : i32, i32
  }
  func.func @transform_5(%arg0: i32) -> (i32, i32) {
    %c0_i32 = arith.constant 0 : i32
    %c0_i32_0 = arith.constant 0 : i32
    %c0_i32_1 = arith.constant 0 : i32
    return %c0_i32, %c0_i32_0 : i32, i32
  }
  func.func @transform_6(%arg0: i32) -> (i32, i32) {
    %c0_i32 = arith.constant 0 : i32
    %c0_i32_0 = arith.constant 0 : i32
    %c0_i32_1 = arith.constant 0 : i32
    return %c0_i32, %c0_i32_0 : i32, i32
  }
  func.func @transform_7(%arg0: i32) -> (i32, i32) {
    %c0_i32 = arith.constant 0 : i32
    %c0_i32_0 = arith.constant 0 : i32
    return %arg0, %c0_i32 : i32, i32
  }
}

</mosaic_0001>

<bundles_post_ra>
// kernel: tpu_custom_call.1
= control target key start
LH: loop header
LB: loop body
LE: loop exit
PB: predicated region body
PF: predicated region fallthrough
CT: control target
= control target key end

     0   :  { %13 = vsyncpa [#allocation4], 0  ;;  %s466_s0 = inlined_call_operand.<no memory space> [shape: f32[1,1], index: 0, kind: input, shape index: {}]   ;;  %s467_s1 = inlined_call_operand.hbm [shape: f32[16,48], index: 1, kind: input, shape index: {}]   ;;  %s468_s2 = inlined_call_operand.hbm [shape: f32[48,128], index: 2, kind: input, shape index: {}]   ;;  %s469_s3 = inlined_call_operand.vmem [shape: f32[1,128], index: 3, kind: input, shape index: {}]   ;;  %s470_s4 = inlined_call_operand.vmem [shape: f32[1,128], index: 4, kind: input, shape index: {}]   ;;  %s471_s5 = inlined_call_operand.hbm [shape: f32[128,128], index: 5, kind: input, shape index: {}]   ;;  %s472_s6 = inlined_call_operand.vmem [shape: f32[1,128], index: 6, kind: input, shape index: {}]   ;;  %s473_s7 = inlined_call_operand.hbm [shape: f32[16,128], index: 7, kind: output, shape index: {}]  }
   0x1   :  { %14 = vsyncpa [#allocation7], 0 }
   0x2   :  { %15 = vsyncpa [#allocation5], 0  ;;  %s35_s26 = sshll.u32 %s468_s2, 4  ;;  %s380_s27 = smov [#allocation6]   ;;  %s36_s26 = int_to_ptr.hbm [resolvable:$true] %s35_s26 }
   0x3   :  { %s37_s28 = sshll.u32 %s380_s27, 4  ;;  %s22_s8 = sshll.u32 %s467_s1, 4  ;;  %s38_s28 = int_to_ptr.vmem [resolvable:$true] %s37_s28  ;;  %s23_s8 = int_to_ptr.hbm [resolvable:$true] %s22_s8 }
   0x4   :  { %s381_s9 = smov 128   ;;  %s382_s10 = smov 8  }
   0x5   :  { %43 = dma.hbm_to_vmem [thread:$0]  %s36_s26, 768, %s38_s28, [#allocation7], %s381_s9, %s381_s9, %s382_s10  }
   0x6   :  { %s383_s11 = smov [#allocation3]   ;;  %s52_s2 = sshll.u32 %s471_s5, 4  ;;  %s53_s2 = int_to_ptr.hbm [resolvable:$true] %s52_s2 }
   0x7   :  { %s24_s12 = sshll.u32 %s383_s11, 4  ;;  %s384_s1 = smov [#allocation8]   ;;  %s25_s12 = int_to_ptr.vmem [resolvable:$true] %s24_s12 }
   0x8   :  { %30 = dma.hbm_to_vmem [thread:$0]  %s23_s8, 256, %s25_s12, [#allocation4], %s381_s9, %s381_s9, %s382_s10  }
   0x9   :  { %s54_s15 = sshll.u32 %s384_s1, 4  ;;  %s55_s15 = int_to_ptr.vmem [resolvable:$true] %s54_s15 }
   0xa   :  { %60 = dma.hbm_to_vmem [thread:$0]  %s53_s2, 2048, %s55_s15, [#allocation7], %s381_s9, %s381_s9, %s382_s10  }
   0xb   :  { %374 = dma.done.wait [#allocation4], 256  }
   0xc   :  { %375 = vsyncadd [#allocation4], 4294967040 }
   0xd   :  { %376 = dma.done.wait [#allocation7], 2816  }
   0xe   :  { %377 = vsyncadd [#allocation7], 4294964480  ;;  %v83_v0 = vld [vmem:[#allocation6 + $0x28] sm:$0xff]  ;;  %v82_v1 = vld [vmem:[#allocation6 + $0x20] sm:$0xff]  ;;  %vm90_vm0 = vcmask 392192   ;;  %v85_v25 = vstv %s466_s0  ;;  %v211_v48 = vlaneseq  ;;  %s224_s23 = sshll.u32 %s473_s7, 4  ;;  %s225_s23 = int_to_ptr.hbm [resolvable:$true] %s224_s23 }
   0xf   :  { %107 = vmatpush.msra.mxu0 %v83_v0  ;;  %v81_v2 = vld [vmem:[#allocation6 + $0x18] sm:$0xff]  ;;  %v143_v3 = vld [vmem:[#allocation8 + $0x78] sm:$0xff]  ;;  %v142_v4 = vld [vmem:[#allocation8 + $0x70] sm:$0xff] }
  0x10   :  { %148 = vmatpush.msra.mxu1 %v143_v3  ;;  %v80_v5 = vld [vmem:[#allocation6 + $0x10] sm:$0xff]  ;;  %v141_v6 = vld [vmem:[#allocation8 + $0x68] sm:$0xff]  ;;  %242 = vmatpush.msra.mxu2 %v143_v3  ;;  %v79_v7 = vld [vmem:[#allocation6 + $0x8] sm:$0xff]  ;;  %v212_v54 = vand.u32 127, %v211_v48 }
  0x11   :  { %108 = vmatpush.msra.mxu0 %v82_v1  ;;  %v140_v8 = vld [vmem:[#allocation8 + $0x60] sm:$0xff]  ;;  %v78_v9 = vld [vmem:[#allocation6] sm:$0xff]  ;;  %v139_v10 = vld [vmem:[#allocation8 + $0x58] sm:$0xff] }
  0x12   :  { %149 = vmatpush.msra.mxu1 %v142_v4  ;;  %243 = vmatpush.msra.mxu2 %v142_v4  ;;  %v76_v11 = vld [vmem:[#allocation3] sm:$0xff]  ;;  %v138_v12 = vld [vmem:[#allocation8 + $0x50] sm:$0xff]  ;;  %v137_v13 = vld [vmem:[#allocation8 + $0x48] sm:$0xff]  ;;  %vm213_vm5 = vcmp.eq.s32.totalorder %v212_v54, 48 }
  0x13   :  { %109 = vmatpush.msra.mxu0 %v81_v2  ;;  %v136_v14 = vld [vmem:[#allocation8 + $0x40] sm:$0xff]  ;;  %v135_v15 = vld [vmem:[#allocation8 + $0x38] sm:$0xff]  ;;  %v77_v16 = vld [vmem:[#allocation3 + $0x8] sm:$0xff] }
  0x14   :  { %150 = vmatpush.msra.mxu1 %v141_v6  ;;  %244 = vmatpush.msra.mxu2 %v141_v6  ;;  %v134_v17 = vld [vmem:[#allocation8 + $0x30] sm:$0xff]  ;;  %v133_v18 = vld [vmem:[#allocation8 + $0x28] sm:$0xff]  ;;  %v132_v19 = vld [vmem:[#allocation8 + $0x20] sm:$0xff] }
  0x15   :  { %110 = vmatpush.msra.mxu0 %v80_v5  ;;  %v131_v20 = vld [vmem:[#allocation8 + $0x18] sm:$0xff]  ;;  %v130_v21 = vld [vmem:[#allocation8 + $0x10] sm:$0xff]  ;;  %v129_v22 = vld [vmem:[#allocation8 + $0x8] sm:$0xff] }
  0x16   :  { %151 = vmatpush.msra.mxu1 %v140_v8  ;;  %245 = vmatpush.msra.mxu2 %v140_v8  ;;  %v128_v23 = vld [vmem:[#allocation8] sm:$0xff] }
  0x17   :  { %111 = vmatpush.msra.mxu0 %v79_v7  ;;  %v84_v24 = vld [vmem:[%s469_s3] sm:$0x1] }
  0x18   :  { %152 = vmatpush.msra.mxu1 %v139_v10  ;;  %246 = vmatpush.msra.mxu2 %v139_v10  ;;  %v86_v26 = vmul.f32 %v85_v25, %v84_v24  ;;  %v264_v28 = vld [vmem:[%s470_s4] ss:$0 sm:$0xff]  ;;  %s385_s4 = smov [#allocation9]  }
  0x19   :  { %112 = vmatpush.msra.mxu0 %v78_v9  ;;  %v265_v37 = vld [vmem:[%s472_s6] ss:$0 sm:$0xff]  ;;  %s222_s6 = sshll.u32 %s385_s4, 4  ;;  %s223_s6 = int_to_ptr.vmem [resolvable:$true] %s222_s6 }
  0x1a   :  { %238 = vmatmul.msk.f32.vlgmr.msra.gmra.mxu0 %vm90_vm0, %v76_v11  ;;  %153 = vmatpush.msra.mxu1 %v138_v12  ;;  %v88_v27 = vperm.slane %v86_v26, 0 }
  0x1b   :  { %247 = vmatpush.msra.mxu2 %v138_v12 }
  0x1c   :  { %154 = vmatpush.msra.mxu1 %v137_v13 }
  0x1d   :  { %248 = vmatpush.msra.mxu2 %v137_v13 }
  0x1e   :  { %155 = vmatpush.msra.mxu1 %v136_v14 }
  0x1f   :  { %249 = vmatpush.msra.mxu2 %v136_v14 }
  0x20   :  { %156 = vmatpush.msra.mxu1 %v135_v15 }
  0x21   :  { %250 = vmatpush.msra.mxu2 %v135_v15 }
  0x22   :  { %239 = vmatmul.msk.f32.gmra.mxu0 %vm90_vm0, %v77_v16  ;;  %157 = vmatpush.msra.mxu1 %v134_v17 }
  0x23   :  { %251 = vmatpush.msra.mxu2 %v134_v17 }
  0x24   :  { %158 = vmatpush.msra.mxu1 %v133_v18 }
  0x25   :  { %252 = vmatpush.msra.mxu2 %v133_v18 }
  0x26   :  { %159 = vmatpush.msra.mxu1 %v132_v19 }
  0x27   :  { %253 = vmatpush.msra.mxu2 %v132_v19 }
  0x28   :  { %160 = vmatpush.msra.mxu1 %v131_v20 }
  0x29   :  { %254 = vmatpush.msra.mxu2 %v131_v20 }
  0x2a   :  { %161 = vmatpush.msra.mxu1 %v130_v21 }
  0x2b   :  { %255 = vmatpush.msra.mxu2 %v130_v21 }
  0x2c   :  { %162 = vmatpush.msra.mxu1 %v129_v22 }
  0x2d   :  { %256 = vmatpush.msra.mxu2 %v129_v22 }
  0x2e   :  { %163 = vmatpush.msra.mxu1 %v128_v23 }
  0x2f   :  { %257 = vmatpush.msra.mxu2 %v128_v23 }
  0x97   :  { %v114_v29 = vpop.f32.mrf.mxu0 }
  0x98   :  { %v115_v30 = vadd.f32 %v114_v29, %v88_v27 }
  0x9a   :  { %v124_v31 = vadd.f32 %v264_v28, %v115_v30 }
  0x9c   :  { %266 = vtanh.f32 %v124_v31 }
  0x9f   :  { %v117_v32 = vpop.f32.mrf.mxu0 }
  0xa0   :  { %v118_v33 = vadd.f32 %v117_v32, %v88_v27 }
  0xa2   :  { %v267_v34 = vpop.eup %266  ;;  %v125_v35 = vadd.f32 %v264_v28, %v118_v33 }
  0xa3   :  { %164 = vmatmul.f32.vlgmr.msra.gmra.mxu1 %v267_v34 }
  0xa4   :  { %268 = vtanh.f32 %v125_v35 }
  0xaa   :  { %v269_v36 = vpop.eup %268 }
  0xab   :  { %167 = vmatmul.f32.vlgmr.msra.gmra.mxu2 %v269_v36 }
 0x120   :  { %v165_v38 = vpop.f32.mrf.mxu1 }
 0x121   :  { %v166_v39 = vadd.f32 %v265_v37, %v165_v38 }
 0x123   :  { %v240_v40 = vmul.f32 -1.442695, %v166_v39 }
 0x125   :  { %270 = vpow2.f32 %v240_v40 }
 0x12b   :  { %v271_v41 = vpop.eup %270 }
 0x12c   :  { %v177_v42 = vadd.f32 1.0, %v271_v41 }
 0x12e   :  { %272 = vrcp.f32 %v177_v42  ;;  %v168_v43 = vpop.f32.mrf.mxu2  ;;  %v190_v50 = vand.u32 2147483648, %v177_v42  ;;  %v188_v53 = vand.u32 2147483647, %v177_v42  ;;  %vm184_vm2 = vweird.f32 %v177_v42 }
 0x12f   :  { %v169_v44 = vadd.f32 %v265_v37, %v168_v43 }
 0x130   :  { %v191_v57 = vor.u32 1.1754944e-38, %v190_v50  ;;  %vm189_vm4 = vcmp.eq.f32.partialorder %v188_v53, 8.507059e+37 }
 0x131   :  { %v241_v45 = vmul.f32 -1.442695, %v169_v44 }
 0x133   :  { %274 = vpow2.f32 %v241_v45 }
 0x134   :  { %v273_v46 = vpop.eup %272 }
 0x135   :  { %v180_v47 = vmul.f32 %v273_v46, %v177_v42  ;;  %vm185_vm1 = vweird.f32 %v273_v46 }
 0x136   :  { %vm186_vm3 = vmor %vm184_vm2, %vm185_vm1 }
 0x137   :  { %v181_v49 = vsub.f32 1.0, %v180_v47 }
 0x139   :  { %v275_v51 = vpop.eup %274  ;;  %v182_v52 = vmul.f32 %v273_v46, %v181_v49 }
 0x13a   :  { %v178_v55 = vadd.f32 1.0, %v275_v51 }
 0x13b   :  { %v183_v56 = vadd.f32 %v273_v46, %v182_v52 }
 0x13c   :  { %276 = vrcp.f32 %v178_v55  ;;  %v205_v1 = vand.u32 2147483648, %v178_v55  ;;  %v203_v3 = vand.u32 2147483647, %v178_v55  ;;  %vm199_vm7 = vweird.f32 %v178_v55 }
 0x13d   :  { %v187_v58 = vsel %vm186_vm3, %v273_v46, %v183_v56 }
 0x13e   :  { %v192_v59 = vsel %vm189_vm4, %v191_v57, %v187_v58  ;;  %v206_v5 = vor.u32 1.1754944e-38, %v205_v1  ;;  %vm204_vm9 = vcmp.eq.f32.partialorder %v203_v3, 8.507059e+37 }
 0x13f   :  { %v209_v60 = vmul.f32 50.0, %v192_v59 }
 0x141   :  { %v214_v61 = vsel %vm213_vm5, %v209_v60, %v166_v39 }
 0x142   :  { %v277_v62 = vpop.eup %276  ;;  %216 = vst [vmem:[#allocation9] sm:$0xff] %v214_v61 }
 0x143   :  { %v195_v63 = vmul.f32 %v277_v62, %v178_v55  ;;  %vm200_vm6 = vweird.f32 %v277_v62 }
 0x144   :  { %vm201_vm8 = vmor %vm199_vm7, %vm200_vm6 }
 0x145   :  { %v196_v0 = vsub.f32 1.0, %v195_v63 }
 0x147   :  { %v197_v2 = vmul.f32 %v277_v62, %v196_v0 }
 0x149   :  { %v198_v4 = vadd.f32 %v277_v62, %v197_v2 }
 0x14b   :  { %v202_v6 = vsel %vm201_vm8, %v277_v62, %v198_v4 }
 0x14c   :  { %v207_v7 = vsel %vm204_vm9, %v206_v5, %v202_v6 }
 0x14d   :  { %v210_v8 = vmul.f32 50.0, %v207_v7 }
 0x14f   :  { %v215_v9 = vsel %vm213_vm5, %v210_v8, %v169_v44 }
 0x150   :  { %217 = vst [vmem:[#allocation9 + $0x8] sm:$0xff] %v215_v9 }
 0x151   :  { %230 = dma.vmem_to_hbm [thread:$0]  %s223_s6, 256, %s225_s23, [#allocation5], %s381_s9, %s381_s9, %s382_s10  }
 0x152   :  { %378 = dma.done.wait [#allocation5], 256  }
 0x153   :  { %379 = vsyncadd [#allocation5], 4294967040 }
 0x154   :  { %235 = vsyncpa [#allocation4], 1 }
 0x155   :  { %236 = vsyncpa [#allocation7], 1 }
 0x156   :  { %237 = vsyncpa [#allocation5], 1 }

</bundles_post_ra>
